<compile_context>
chip_gen: v6e
topology: v6e:2x2x1
jax: 0.10.0
libtpu: 0.0.40
codegen_flags: <defaults>
</compile_context>

<pallas_src>
import functools

import jax
import jax.numpy as jnp
from jax import lax
from jax.experimental import pallas as pl
from jax.experimental.pallas import tpu as pltpu

_ACTIVATIONS = {
    "sigmoid": jax.nn.sigmoid,
    "relu": lambda v: jnp.maximum(v, 0.0),
    "leakyrelu": lambda v: jnp.where(v >= 0, v, 0.01 * v),   # PyTorch default slope
    "tanh": jnp.tanh,
}

# Full-fp32 matmul on every path (compiled Mosaic, interpret mode, XLA reference).
_DOT = functools.partial(jnp.dot, preferred_element_type=jnp.float32,
                         precision=lax.Precision.HIGHEST)


def _head_and_batchnorm(h, wl_row, bl, inv_b, out_dtype):
    """1-wide linear head on VPU/XLU + fused BatchNorm1d(1, eps=0) epilogue."""
    # Head: (B, lin_in) * (1, lin_in) broadcast-multiply + lane reduce -> (B, 1).
    y = jnp.sum(h * wl_row, axis=-1, keepdims=True) + bl
    # Training-mode batch stats, biased variance, eps = 0 (two-pass, matches PyTorch).
    mean = jnp.sum(y) * inv_b
    d = y - mean
    var = jnp.sum(d * d) * inv_b
    return (d / jnp.sqrt(var)).astype(out_dtype)


def _personnet_kernel_d1(x_ref, w1_ref, b1_ref, wl_ref, bl_ref, o_ref, *,
                         activation, inv_b):
    act = _ACTIVATIONS[activation]
    h = act(_DOT(x_ref[...], w1_ref[...]) + b1_ref[...])             # (B, fc1)
    o_ref[...] = _head_and_batchnorm(h, wl_ref[...], bl_ref[...], inv_b, o_ref.dtype)


def _personnet_kernel_d3(x_ref, w1_ref, b1_ref, w2_ref, b2_ref, w3_ref, b3_ref,
                         wl_ref, bl_ref, o_ref, *, activation, inv_b):
    act = _ACTIVATIONS[activation]
    h = act(_DOT(x_ref[...], w1_ref[...]) + b1_ref[...])             # (B, fc1)
    h = act(_DOT(h, w2_ref[...]) + b2_ref[...])                      # (B, fc2)
    h = act(_DOT(h, w3_ref[...]) + b3_ref[...])                      # (B, fc3)
    o_ref[...] = _head_and_batchnorm(h, wl_ref[...], bl_ref[...], inv_b, o_ref.dtype)


def init_personnet_params(key, num_items, depth=1):
    """Deterministic PyTorch-style (uniform +-1/sqrt(fan_in)) init.

    Hidden weights are stored (in, out); the linear head wl is stored as a
    (1, lin_in) row for the VPU head; bl is a (1, 1) scalar.
    """
    fc1_dim = max(num_items // 2, 2)
    fc2_dim = max(num_items // 4, 2)
    fc3_dim = max(num_items // 8, 2)
    lin_in = fc1_dim if depth == 1 else fc3_dim

    def linear_init(k, fan_in, fan_out):
        kw, kb = jax.random.split(k)
        bound = 1.0 / jnp.sqrt(float(fan_in))
        w = jax.random.uniform(kw, (fan_in, fan_out), jnp.float32, -bound, bound)
        b = jax.random.uniform(kb, (1, fan_out), jnp.float32, -bound, bound)
        return w, b

    k1, k2, k3, kl = jax.random.split(key, 4)
    w1, b1 = linear_init(k1, num_items, fc1_dim)
    w2, b2 = linear_init(k2, fc1_dim, fc2_dim)
    w3, b3 = linear_init(k3, fc2_dim, fc3_dim)
    wl_col, bl = linear_init(kl, lin_in, 1)
    wl = wl_col.T                                   # (1, lin_in) row layout
    return (w1, b1, w2, b2, w3, b3, wl, bl)


def personnet_forward(x, params, *, depth=1, activation="sigmoid"):
    assert depth in (1, 3), "PersonNet only defines a linear head for depth 1 or 3"
    B = x.shape[0]
    w1, b1, w2, b2, w3, b3, wl, bl = params

    if depth == 1:
        kern = functools.partial(_personnet_kernel_d1,
                                 activation=activation, inv_b=1.0 / B)
        inputs = (x, w1, b1, wl, bl)                # unused fc2/fc3 params never shipped
    else:
        kern = functools.partial(_personnet_kernel_d3,
                                 activation=activation, inv_b=1.0 / B)
        inputs = (x, w1, b1, w2, b2, w3, b3, wl, bl)

    vmem_spec = pl.BlockSpec(memory_space=pltpu.MemorySpace.VMEM)
    return pl.pallas_call(
        kern,
        out_shape=jax.ShapeDtypeStruct((B, 1), jnp.float32),
        in_specs=[vmem_spec] * len(inputs),
        out_specs=vmem_spec,
    )(*inputs)


def _reference_forward(x, params, depth=1, activation="sigmoid"):
    act = _ACTIVATIONS[activation]
    w1, b1, w2, b2, w3, b3, wl, bl = params
    h = act(_DOT(x, w1) + b1)
    if depth == 3:
        h = act(_DOT(h, w2) + b2)
        h = act(_DOT(h, w3) + b3)
    y = _DOT(h, wl.T) + bl
    mean = jnp.mean(y)
    var = jnp.mean((y - mean) ** 2)                 # biased, eps = 0
    return (y - mean) / jnp.sqrt(var)


if __name__ == "__main__":
    key = jax.random.PRNGKey(0)
    kx, kp1, kp3 = jax.random.split(key, 3)

    batch, num_items = 8, 32
    activation = "sigmoid"
    x = jax.random.normal(kx, (batch, num_items), jnp.float32)

    for depth, kp in ((1, kp1), (3, kp3)):
        params = init_personnet_params(kp, num_items, depth=depth)
        out = jax.block_until_ready(
            personnet_forward(x, params, depth=depth, activation=activation))
        ref = _reference_forward(x, params, depth=depth, activation=activation)
        assert out.shape == (batch, 1)
        max_err = float(jnp.max(jnp.abs(out - ref)))
        assert jnp.allclose(out, ref, atol=1e-3, rtol=1e-3), (depth, max_err)

    print("KERNEL_OK")
</pallas_src>

<mosaic_0001>
module attributes {stable_mosaic.version = 11 : i64} {
  func.func @_personnet_kernel_d1(%arg0: memref<8x32xf32, #tpu.memory_space<vmem>>, %arg1: memref<32x16xf32, #tpu.memory_space<vmem>>, %arg2: memref<1x16xf32, #tpu.memory_space<vmem>>, %arg3: memref<1x16xf32, #tpu.memory_space<vmem>>, %arg4: memref<1x1xf32, #tpu.memory_space<vmem>>, %arg5: memref<8x1xf32, #tpu.memory_space<vmem>>) attributes {dimension_semantics = [], scalar_prefetch = 0 : i64, scratch_operands = 0 : i64, tpu.core_type = #tpu.core_type<tc>} {
    %c0 = arith.constant 0 : index
    %c0_0 = arith.constant 0 : index
    %0 = vector.load %arg0[%c0, %c0_0] : memref<8x32xf32, #tpu.memory_space<vmem>>, vector<8x32xf32>
    %c0_1 = arith.constant 0 : index
    %c0_2 = arith.constant 0 : index
    %1 = vector.load %arg1[%c0_1, %c0_2] : memref<32x16xf32, #tpu.memory_space<vmem>>, vector<32x16xf32>
    %cst = arith.constant dense<0.000000e+00> : vector<8x16xf32>
    %2 = tpu.matmul %0, %1, %cst {dimension_numbers = #tpu.dot_dimension_numbers<[1], [0], [0], [1], [0, 0, 1, 1], [], []>, precision = #tpu.contract_precision<fp32>} : vector<8x32xf32>, vector<32x16xf32>, vector<8x16xf32> -> vector<8x16xf32>
    %c0_3 = arith.constant 0 : index
    %c0_4 = arith.constant 0 : index
    %3 = vector.load %arg2[%c0_3, %c0_4] : memref<1x16xf32, #tpu.memory_space<vmem>>, vector<1x16xf32>
    %4 = vector.broadcast %3 : vector<1x16xf32> to vector<8x16xf32>
    %5 = arith.addf %2, %4 : vector<8x16xf32>
    %6 = arith.negf %5 : vector<8x16xf32>
    %7 = math.exp %6 : vector<8x16xf32>
    %cst_5 = arith.constant 1.000000e+00 : f32
    %8 = vector.broadcast %cst_5 : f32 to vector<8x16xf32>
    %9 = arith.addf %8, %7 : vector<8x16xf32>
    %10 = arith.divf %8, %9 : vector<8x16xf32>
    %c0_6 = arith.constant 0 : index
    %c0_7 = arith.constant 0 : index
    %11 = vector.load %arg3[%c0_6, %c0_7] : memref<1x16xf32, #tpu.memory_space<vmem>>, vector<1x16xf32>
    %c0_8 = arith.constant 0 : index
    %c0_9 = arith.constant 0 : index
    %12 = vector.load %arg4[%c0_8, %c0_9] : memref<1x1xf32, #tpu.memory_space<vmem>>, vector<1x1xf32>
    %13 = vector.broadcast %11 : vector<1x16xf32> to vector<8x16xf32>
    %14 = arith.mulf %10, %13 : vector<8x16xf32>
    %cst_10 = arith.constant dense<0.000000e+00> : vector<8xf32>
    %15 = vector.multi_reduction <add>, %14, %cst_10 [1] : vector<8x16xf32> to vector<8xf32>
    %16 = vector.shape_cast %15 : vector<8xf32> to vector<8x1xf32>
    %17 = vector.broadcast %12 : vector<1x1xf32> to vector<8x1xf32>
    %18 = arith.addf %16, %17 : vector<8x1xf32>
    %19 = vector.shape_cast %18 : vector<8x1xf32> to vector<1x8x1xf32>
    %cst_11 = arith.constant dense<0.000000e+00> : vector<1xf32>
    %20 = vector.multi_reduction <add>, %19, %cst_11 [1, 2] : vector<1x8x1xf32> to vector<1xf32>
    %21 = vector.shape_cast %20 : vector<1xf32> to vector<1x1x1xf32>
    %22 = vector.extract %21[0, 0, 0] : f32 from vector<1x1x1xf32>
    %cst_12 = arith.constant 1.250000e-01 : f32
    %23 = arith.mulf %22, %cst_12 : f32
    %24 = vector.broadcast %23 : f32 to vector<8x1xf32>
    %25 = arith.subf %18, %24 : vector<8x1xf32>
    %26 = arith.mulf %25, %25 : vector<8x1xf32>
    %27 = vector.shape_cast %26 : vector<8x1xf32> to vector<1x8x1xf32>
    %cst_13 = arith.constant dense<0.000000e+00> : vector<1xf32>
    %28 = vector.multi_reduction <add>, %27, %cst_13 [1, 2] : vector<1x8x1xf32> to vector<1xf32>
    %29 = vector.shape_cast %28 : vector<1xf32> to vector<1x1x1xf32>
    %30 = vector.extract %29[0, 0, 0] : f32 from vector<1x1x1xf32>
    %cst_14 = arith.constant 1.250000e-01 : f32
    %31 = arith.mulf %30, %cst_14 : f32
    %32 = math.sqrt %31 : f32
    %33 = vector.broadcast %32 : f32 to vector<8x1xf32>
    %34 = arith.divf %25, %33 : vector<8x1xf32>
    %c0_15 = arith.constant 0 : index
    %c0_16 = arith.constant 0 : index
    %35 = vector.load %arg5[%c0_15, %c0_16] : memref<8x1xf32, #tpu.memory_space<vmem>>, vector<8x1xf32>
    tpu.vector_store %arg5[%c0_15, %c0_16], %34 {strides = array<i32>} : memref<8x1xf32, #tpu.memory_space<vmem>>, vector<8x1xf32>,
    return
  }
}

</mosaic_0001>

<bundles_post_ra>
// kernel: tpu_custom_call.1
= control target key start
LH: loop header
LB: loop body
LE: loop exit
PB: predicated region body
PF: predicated region fallthrough
CT: control target
= control target key end

     0   :  { %vm34_vm0 = vcmask 261120   ;;  %v708_v0 = vmov 0.0   ;;  %vm709_vm1 = vmmov 0   ;;  %vm538_vm2 = vcmask 130048   ;;  %s837_s1 = inlined_call_operand.vmem [shape: f32[32,16], index: 1, kind: input, shape index: {}]   ;;  %s838_s0 = inlined_call_operand.vmem [shape: f32[8,32], index: 0, kind: input, shape index: {}]   ;;  %s839_s4 = inlined_call_operand.<no memory space> [shape: f32[1,1], index: 4, kind: input, shape index: {}]   ;;  %s840_s2 = inlined_call_operand.vmem [shape: f32[1,16], index: 2, kind: input, shape index: {}]   ;;  %s841_s3 = inlined_call_operand.vmem [shape: f32[1,16], index: 3, kind: input, shape index: {}]   ;;  %s842_s5 = inlined_call_operand.vmem [shape: f32[8,1], index: 5, kind: output, shape index: {}]  }
   0x1   :  { %626 = vmatprep.subr.mxu0 %v708_v0  ;;  %v26_v1 = vld [vmem:[%s837_s1 + $0x18] sm:$0xff]  ;;  %v25_v2 = vld [vmem:[%s837_s1 + $0x10] sm:$0xff]  ;;  %v24_v3 = vld [vmem:[%s837_s1 + $0x8] sm:$0xff]  ;;  %637 = vmatprep.subr.mxu1 %v708_v0  ;;  %v10_v32 = vstv %s839_s4  ;;  %vm549_vm3 = vcmask 7168  }
   0x2   :  { %v751_v4 = vand.u32 4294901760, %v26_v1  ;;  %v753_v5 = vand.u32 4294901760, %v25_v2  ;;  %v755_v6 = vand.u32 4294901760, %v24_v3  ;;  %v23_v7 = vld [vmem:[%s837_s1] sm:$0xff]  ;;  %634 = vmatprep.mubr.msk.f32.mxu0 %vm709_vm1, %v708_v0  ;;  %645 = vmatprep.mubr.msk.f32.mxu1 %vm709_vm1, %v708_v0  ;;  %11 = vst [vmem:[#allocation2] sm:$0x1] %v10_v32 }
   0x3   :  { %v22_v8 = vld [vmem:[%s838_s0] sm:$0xff]  ;;  %v767_v9 = vand.u32 4294901760, %v23_v7 }
   0x4   :  { %v36_v10 = vsel %vm34_vm0, %v22_v8, 0  ;;  %627 = vmatpush3.msra.mxu0 %v751_v4  ;;  %v143_v11 = vsub.f32 %v26_v1, %v751_v4  ;;  %v150_v13 = vsub.f32 %v25_v2, %v753_v5  ;;  %v157_v14 = vsub.f32 %v24_v3, %v755_v6  ;;  %v592_v36 = vld [vmem:[%s840_s2] ss:$0 sm:$0xff] }
   0x5   :  { %v772_v12 = vand.u32 4294901760, %v36_v10  ;;  %628 = vmatprep.subr.mxu0 %v708_v0  ;;  %v164_v15 = vsub.f32 %v23_v7, %v767_v9  ;;  %v594_v55 = vld [vmem:[%s841_s3] ss:$0 sm:$0xff] }
   0x6   :  { %629 = vmatpush3.msra.mxu0 %v753_v5  ;;  %v144_v16 = vand.u32 4294901760, %v143_v11  ;;  %v151_v18 = vand.u32 4294901760, %v150_v13  ;;  %v158_v19 = vand.u32 4294901760, %v157_v14 }
   0x7   :  { %v108_v17 = vsub.f32 %v36_v10, %v772_v12  ;;  %630 = vmatprep.subr.mxu0 %v708_v0  ;;  %v165_v20 = vand.u32 4294901760, %v164_v15 }
   0x8   :  { %631 = vmatpush3.msra.mxu0 %v755_v6  ;;  %v145_v21 = vsub.f32 %v143_v11, %v144_v16  ;;  %v152_v23 = vsub.f32 %v150_v13, %v151_v18  ;;  %v159_v24 = vsub.f32 %v157_v14, %v158_v19 }
   0x9   :  { %v109_v22 = vand.u32 4294901760, %v108_v17  ;;  %632 = vmatprep.subr.mxu0 %v708_v0  ;;  %v166_v28 = vsub.f32 %v164_v15, %v165_v20  ;;  %v595_v59 = vld [vmem:[#allocation2] ss:$0 sm:$0xff] }
   0xa   :  { %633 = vmatpush3.msra.mxu0 %v767_v9  ;;  %v146_v25 = vand.u32 4294901760, %v145_v21  ;;  %v153_v27 = vand.u32 4294901760, %v152_v23  ;;  %v160_v30 = vand.u32 4294901760, %v159_v24 }
   0xb   :  { %v110_v26 = vsub.f32 %v108_v17, %v109_v22  ;;  %648 = vmatprep.subr.mxu0 %v708_v0  ;;  %v167_v31 = vand.u32 4294901760, %v166_v28 }
   0xc   :  { %638 = vmatpush3.msra.mxu1 %v146_v25 }
   0xd   :  { %v111_v29 = vand.u32 4294901760, %v110_v26  ;;  %639 = vmatprep.subr.mxu1 %v708_v0 }
   0xe   :  { %640 = vmatpush3.msra.mxu1 %v153_v27 }
   0xf   :  { %635 = vmatmul.mubr.f32.vlgmr.msra.gmra.mxu0 %v111_v29  ;;  %641 = vmatprep.subr.mxu1 %v708_v0 }
  0x10   :  { %649 = vmatpush3.msra.mxu0 %v143_v11  ;;  %642 = vmatpush3.msra.mxu1 %v160_v30 }
  0x11   :  { %650 = vmatprep.subr.mxu0 %v708_v0  ;;  %643 = vmatprep.subr.mxu1 %v708_v0 }
  0x12   :  { %651 = vmatpush3.msra.mxu0 %v150_v13  ;;  %644 = vmatpush3.msra.mxu1 %v167_v31 }
  0x13   :  { %652 = vmatprep.subr.mxu0 %v708_v0  ;;  %646 = vmatmul.mubr.f32.vlgmr.msra.gmra.mxu1 %v772_v12 }
  0x14   :  { %653 = vmatpush3.msra.mxu0 %v157_v14  ;;  %659 = vmatprep.subr.mxu1 %v708_v0 }
  0x15   :  { %654 = vmatprep.subr.mxu0 %v708_v0  ;;  %660 = vmatpush3.msra.mxu1 %v751_v4 }
  0x16   :  { %655 = vmatpush3.msra.mxu0 %v164_v15  ;;  %656 = vmatprep.mubr.msk.f32.mxu0 %vm709_vm1, %v708_v0 }
  0x17   :  { %661 = vmatprep.subr.mxu1 %v708_v0  ;;  %670 = vmatprep.subr.mxu0 %v708_v0 }
  0x18   :  { %657 = vmatmul.mubr.f32.vlgmr.msra.gmra.mxu0 %v108_v17  ;;  %662 = vmatpush3.msra.mxu1 %v753_v5 }
  0x19   :  { %671 = vmatpush3.msra.mxu0 %v144_v16  ;;  %663 = vmatprep.subr.mxu1 %v708_v0 }
  0x1a   :  { %672 = vmatprep.subr.mxu0 %v708_v0  ;;  %664 = vmatpush3.msra.mxu1 %v755_v6 }
  0x1b   :  { %673 = vmatpush3.msra.mxu0 %v151_v18  ;;  %665 = vmatprep.subr.mxu1 %v708_v0 }
  0x1c   :  { %674 = vmatprep.subr.mxu0 %v708_v0  ;;  %666 = vmatpush3.msra.mxu1 %v767_v9 }
  0x1d   :  { %667 = vmatprep.mubr.msk.f32.mxu1 %vm709_vm1, %v708_v0  ;;  %675 = vmatpush3.msra.mxu0 %v158_v19 }
  0x1e   :  { %668 = vmatmul.mubr.f32.vlgmr.msra.gmra.mxu1 %v109_v22  ;;  %676 = vmatprep.subr.mxu0 %v708_v0 }
  0x1f   :  { %681 = vmatprep.subr.mxu1 %v708_v0  ;;  %677 = vmatpush3.msra.mxu0 %v165_v20 }
  0x20   :  { %678 = vmatprep.mubr.msk.f32.mxu0 %vm709_vm1, %v708_v0  ;;  %682 = vmatpush3.msra.mxu1 %v751_v4 }
  0x21   :  { %679 = vmatmul.mubr.f32.vlgmr.msra.gmra.mxu0 %v772_v12  ;;  %683 = vmatprep.subr.mxu1 %v708_v0 }
  0x22   :  { %689 = vmatprep.mubr.msk.f32.mxu1 %vm709_vm1, %v708_v0  ;;  %684 = vmatpush3.msra.mxu1 %v753_v5 }
  0x23   :  { %685 = vmatprep.subr.mxu1 %v708_v0 }
  0x24   :  { %686 = vmatpush3.msra.mxu1 %v755_v6 }
  0x25   :  { %687 = vmatprep.subr.mxu1 %v708_v0 }
  0x26   :  { %688 = vmatpush3.msra.mxu1 %v767_v9 }
  0x27   :  { %690 = vmatmul.mubr.f32.vlgmr.msra.gmra.mxu1 %v772_v12 }
  0xcf   :  { %v113_v33 = vpop.f32.mrf.mxu0 }
  0xd0   :  { %v114_v39 = vadd.f32 %v592_v36, %v113_v33 }
  0xd1   :  { %v636_v34 = vpop.f32.mrf.mxu0 }
  0xd3   :  { %v204_v35 = vpop.f32.mrf.mxu1 }
  0xd4   :  { %v205_v41 = vadd.f32 %v204_v35, %v114_v39 }
  0xd5   :  { %v647_v37 = vpop.f32.mrf.mxu1 }
  0xd8   :  { %v284_v38 = vpop.f32.mrf.mxu0 }
  0xd9   :  { %v285_v44 = vadd.f32 %v284_v38, %v205_v41 }
  0xda   :  { %v658_v40 = vpop.f32.mrf.mxu0 }
  0xde   :  { %v361_v42 = vpop.f32.mrf.mxu1 }
  0xdf   :  { %v362_v46 = vadd.f32 %v361_v42, %v285_v44 }
  0xe0   :  { %v669_v43 = vpop.f32.mrf.mxu1 }
  0xe1   :  { %v444_v45 = vpop.f32.mrf.mxu0 }
  0xe2   :  { %v445_v48 = vadd.f32 %v444_v45, %v362_v46 }
  0xe3   :  { %v680_v47 = vpop.f32.mrf.mxu0 }
  0xe7   :  { %v519_v49 = vpop.f32.mrf.mxu1 }
  0xe8   :  { %v520_v50 = vadd.f32 %v519_v49, %v445_v48 }
  0xe9   :  { %v691_v51 = vpop.f32.mrf.mxu1 }
  0xea   :  { %v593_v52 = vmul.f32 -1.442695, %v520_v50 }
  0xec   :  { %700 = vpow2.f32 %v593_v52 }
  0xf9   :  { %v701_v53 = vpop.eup %700 }
  0xfa   :  { %v526_v54 = vadd.f32 1.0, %v701_v53 }
  0xfc   :  { %702 = vrcp.f32 %v526_v54 }
 0x109   :  { %v703_v56 = vpop.eup %702 }
 0x10a   :  { %v537_v57 = vmul.f32 %v703_v56, %v594_v55 }
 0x10c   :  { %v539_v58 = vsel %vm538_vm2, %v537_v57, 0.0 }
 0x10d   :  { %540 = vadd.xlane.f32.xlu0 %v539_v58 }
 0x196   :  { %v541_v60 = vpop.xlane.xlu0 %540 }
 0x197   :  { %v548_v61 = vadd.f32 %v595_v59, %v541_v60 }
 0x199   :  { %v550_v62 = vsel %vm549_vm3, %v548_v61, 0.0 }
 0x19a   :  { %551 = vadd.xlane.f32.xlu0 %v550_v62 }
 0x223   :  { %v552_v63 = vpop.xlane.xlu0 %551 }
 0x224   :  { %v553_v0 = vrot.slane %v552_v63, 4 }
 0x226   :  { %v554_v1 = vadd.f32 %v553_v0, %v552_v63 }
 0x228   :  { %v555_v2 = vrot.slane %v554_v1, 2 }
 0x22a   :  { %v556_v3 = vadd.f32 %v555_v2, %v554_v1 }
 0x22c   :  { %v557_v4 = vrot.slane %v556_v3, 1 }
 0x22e   :  { %v558_v5 = vadd.f32 %v557_v4, %v556_v3 }
 0x230   :  { %692 = vpush %v558_v5 }
 0x261   :  { %s693_s3 = spop %692 }
 0x262   :  { %s560_s30 = smul.f32 0.125, %s693_s3 }
 0x264   :  { %v561_v6 = vstv %s560_s30 }
 0x265   :  { %v562_v7 = vsub.f32 %v548_v61, %v561_v6 }
 0x267   :  { %v563_v8 = vmul.f32 %v562_v7, %v562_v7 }
 0x269   :  { %v564_v9 = vsel %vm549_vm3, %v563_v8, 0.0 }
 0x26a   :  { %565 = vadd.xlane.f32.xlu1 %v564_v9 }
 0x2f3   :  { %v566_v10 = vpop.xlane.xlu1 %565 }
 0x2f4   :  { %v567_v11 = vrot.slane %v566_v10, 4 }
 0x2f6   :  { %v568_v12 = vadd.f32 %v567_v11, %v566_v10 }
 0x2f8   :  { %v569_v13 = vrot.slane %v568_v12, 2 }
 0x2fa   :  { %v570_v14 = vadd.f32 %v569_v13, %v568_v12 }
 0x2fc   :  { %v571_v15 = vrot.slane %v570_v14, 1 }
 0x2fe   :  { %v572_v16 = vadd.f32 %v571_v15, %v570_v14 }
 0x300   :  { %694 = vpush %v572_v16 }
 0x331   :  { %s695_s6 = spop %694 }
 0x332   :  { %s574_s7 = smul.f32 0.125, %s695_s6 }
 0x334   :  { %v575_v17 = vstv %s574_s7 }
 0x335   :  { %704 = vrsqrt.f32 %v575_v17  ;;  %vm578_vm4 = vcmp.eq.f32.partialorder %v575_v17, inf  ;;  %v581_v20 = vand.u32 2147483648, %v575_v17  ;;  %vm580_vm5 = vcmp.eq.f32.partialorder %v575_v17, 0.0 }
 0x342   :  { %v705_v18 = vpop.eup %704 }
 0x343   :  { %v577_v19 = vmul.f32 %v705_v18, %v575_v17 }
 0x345   :  { %v579_v21 = vsel %vm578_vm4, %v575_v17, %v577_v19 }
 0x346   :  { %v582_v22 = vsel %vm580_vm5, %v581_v20, %v579_v21 }
 0x347   :  { %696 = vpush %v582_v22 }
 0x378   :  { %s697_s8 = spop %696 }
 0x379   :  { %v584_v23 = vstv %s697_s8 }
 0x37a   :  { %706 = vrcp.f32 %v584_v23 }
 0x387   :  { %v707_v24 = vpop.eup %706 }
 0x388   :  { %v586_v25 = vmul.f32 %v707_v24, %v562_v7 }
 0x38a   :  { %587 = vst.msk [vmem:[%s842_s5] sm:$0xff] %vm549_vm3, %v586_v25 }

</bundles_post_ra>
